<compile_context>
chip_gen: v5e
topology: v5e:2x2
jax: 0.10.0
libtpu: 0.0.40
codegen_flags: <defaults>
</compile_context>

<pallas_src>
import math

import jax
import jax.numpy as jnp
from jax.experimental import pallas as pl
from jax.experimental.pallas import tpu as pltpu


# ---------------------------------------------------------------------------
# Kernel: one (batch-tile, head) grid step.
# ---------------------------------------------------------------------------
def _self_attention_kernel(v_ref, k_ref, q_ref, bias_ref,
                           wv_ref, bv_ref, wk_ref, bk_ref, wq_ref, bq_ref,
                           wo_ref, bo_ref,
                           attn_ref, out_ref):
    """Block shapes:
      v/k/q:    (B, L, E)   compute dtype (bf16 by default)
      bias:     (L, L)      f32 additive mask bias (0 / -1e20), hoisted
      wv/wk/wq: (1, E, D)   per-head column blocks of W^T (compute dtype)
      bv/bk/bq: (1, 1, D)   per-head bias slices (f32)
      wo:       (1, D, E)   per-head row block of Wo^T (compute dtype)
      bo:       (1, E)      f32
      attn:     (B, 1, L, L) f32  (per-head slice of (N, H, L, L))
      out:      (B, L, E)   f32, resident across the head axis (accumulated)
    """
    B, L, E = v_ref.shape
    D = wv_ref.shape[2]
    h = pl.program_id(1)
    f32 = jnp.float32
    cdt = v_ref.dtype                          # MXU compute dtype
    scale = f32(1.0 / math.sqrt(E))            # softmax scale folded into q

    v2d = v_ref[...].reshape(B * L, E)         # leading-dim merge only
    k2d = k_ref[...].reshape(B * L, E)
    q2d = q_ref[...].reshape(B * L, E)

    # Per-head projections: (B*L, E) x (E, D) on the MXU, f32 accumulation.
    v_h = jnp.dot(v2d, wv_ref[0], preferred_element_type=f32) + bv_ref[0]
    k_h = jnp.dot(k2d, wk_ref[0], preferred_element_type=f32) + bk_ref[0]
    q_h = (jnp.dot(q2d, wq_ref[0], preferred_element_type=f32) + bq_ref[0]) * scale

    q3 = q_h.reshape(B, L, D).astype(cdt)      # leading-dim split only
    k3 = k_h.reshape(B, L, D).astype(cdt)
    v3 = v_h.reshape(B, L, D).astype(cdt)

    # energy = (q / sqrt(E)) @ k^T  + additive mask bias (masked_fill equiv).
    energy = jnp.einsum("bqd,bkd->bqk", q3, k3,
                        preferred_element_type=f32)            # (B, L, L) f32
    energy = energy + bias_ref[...]

    # Numerically-stable softmax in f32; masked logits underflow to exactly 0.
    m = jnp.max(energy, axis=-1, keepdims=True)
    p = jnp.exp(energy - m)
    s = jnp.sum(p, axis=-1, keepdims=True)
    attn = p * pl.reciprocal(s, approx=False)                  # EUP, exact norm

    attn_ref[...] = attn.reshape(B, 1, L, L)

    # Per-head context, then this head's slice of the output projection,
    # accumulated into the resident out block: out = sum_h o_h @ Wo^T[hD:(h+1)D, :]
    o_h = jnp.einsum("bqk,bkd->bqd", attn.astype(cdt), v3,
                     preferred_element_type=f32)               # (B, L, D) f32
    contrib = jnp.dot(o_h.reshape(B * L, D).astype(cdt), wo_ref[0],
                      preferred_element_type=f32).reshape(B, L, E)

    @pl.when(h == 0)
    def _():
        out_ref[...] = jnp.broadcast_to(bo_ref[...], (B, L, E)).astype(f32)

    out_ref[...] += contrib


# ---------------------------------------------------------------------------
# Generation-aware tiling helpers.
# ---------------------------------------------------------------------------
def _vmem_budget_bytes():
    """Scoped-VMEM budget derived from the chip (v7x: 64 MiB, v5e/v6e: 128 MiB),
    keeping ~25% headroom for Mosaic internal scratch."""
    try:
        cap = int(getattr(pltpu.get_tpu_info(), "vmem_capacity_bytes", 0))
    except Exception:  # pragma: no cover - hw query unsupported; be conservative
        cap = 0
    if cap <= 0:
        cap = 64 * 1024 * 1024                 # conservative (v7x-sized) default
    return max(32 * 1024 * 1024, min(int(0.75 * cap), 96 * 1024 * 1024))


def _pick_batch_tile(N, L, E, compute_dtype, vmem_budget):
    """Largest divisor of N that (a) keeps >= 2 parallel grid steps when N >= 2
    (v7x has 2 TensorCores), (b) keeps the per-step working set well inside the
    VMEM budget, (c) caps B*L so the (B, L, L) softmax tile stays modest."""
    in_bytes = jnp.dtype(compute_dtype).itemsize
    best = 1
    for b in range(1, N + 1):
        if N % b != 0:
            continue
        if N >= 2 and N // b < 2:
            continue
        est = (2 * 3 * b * L * E * in_bytes        # double-buffered v/k/q blocks
               + 2 * b * L * L * 4                 # attention output block
               + 2 * b * L * E * 4                 # resident output block
               + 8 * b * L * E * 4                 # live f32 temporaries
               + 4 * b * L * L * 4)
        if est <= vmem_budget // 2 and b * L <= 1024:
            best = b
    return best


# ---------------------------------------------------------------------------
# Public wrapper (same signature/semantics as the torch module's forward).
# ---------------------------------------------------------------------------
def self_attention_pallas(values, keys, query, mask, params, heads,
                          batch_tile=None, compute_dtype=jnp.bfloat16):
    """values/keys/query: (N, L, E); mask: (L, L) int (1 = keep) or None.
    params = (wv, bv, wk, bk, wq, bq, wo, bo) with torch.nn.Linear layout
    (W: (out, in), b: (1, out)).  Returns (attention (N, H, L, L) f32,
    out (N, L, E) f32), matching SelfAttention.forward."""
    N, L, E = query.shape
    H = heads
    D = E // H
    assert D * H == E, "Embedding size needs to be divisible by heads"
    wv, bv, wk, bk, wq, bq, wo, bo = params

    # ---- wrapper-side layout plumbing (plain XLA, outside the kernel) ----
    def col_blocks(w):                         # (E, E) -> (H, E, D): W^T cols per head
        return jnp.transpose(w.T.reshape(E, H, D), (1, 0, 2)).astype(compute_dtype)

    def bias_blocks(b):                        # (1, E) -> (H, 1, D)
        return jnp.transpose(b.reshape(1, H, D), (1, 0, 2)).astype(jnp.float32)

    wvh, wkh, wqh = col_blocks(wv), col_blocks(wk), col_blocks(wq)
    bvh, bkh, bqh = bias_blocks(bv), bias_blocks(bk), bias_blocks(bq)
    woh = wo.T.reshape(H, D, E).astype(compute_dtype)          # Wo^T row blocks
    bo_f = bo.reshape(1, E).astype(jnp.float32)

    # Additive mask bias hoisted out of the kernel (masked_fill equivalent).
    if mask is None:
        mask_bias = jnp.zeros((L, L), jnp.float32)
    else:
        mask_bias = jnp.where(mask != 0, 0.0, -1e20).astype(jnp.float32)

    v_c = values.astype(compute_dtype)
    k_c = keys.astype(compute_dtype)
    q_c = query.astype(compute_dtype)

    vmem_budget = _vmem_budget_bytes()
    if batch_tile is None:
        batch_tile = _pick_batch_tile(N, L, E, compute_dtype, vmem_budget)
    B = batch_tile
    assert N % B == 0

    grid = (N // B, H)                         # head axis last = reduction axis

    vec3 = pl.BlockSpec((B, L, E), lambda n, h: (n, 0, 0))
    w_spec = pl.BlockSpec((1, E, D), lambda n, h: (h, 0, 0))
    b_spec = pl.BlockSpec((1, 1, D), lambda n, h: (h, 0, 0))

    grid_spec = pltpu.PrefetchScalarGridSpec(
        num_scalar_prefetch=0,
        grid=grid,
        in_specs=[
            vec3, vec3, vec3,                                   # values/keys/query
            pl.BlockSpec((L, L), lambda n, h: (0, 0)),          # mask bias
            w_spec, b_spec,                                     # Wv^T cols, bv
            w_spec, b_spec,                                     # Wk^T cols, bk
            w_spec, b_spec,                                     # Wq^T cols, bq
            pl.BlockSpec((1, D, E), lambda n, h: (h, 0, 0)),    # Wo^T rows
            pl.BlockSpec((1, E), lambda n, h: (0, 0)),          # bo
        ],
        out_specs=[
            pl.BlockSpec((B, 1, L, L), lambda n, h: (n, h, 0, 0)),   # attention
            pl.BlockSpec((B, L, E), lambda n, h: (n, 0, 0)),         # out (resident over h)
        ],
    )

    out_shapes = (
        jax.ShapeDtypeStruct((N, H, L, L), jnp.float32),
        jax.ShapeDtypeStruct((N, L, E), jnp.float32),
    )

    cost = pl.CostEstimate(
        flops=int(8 * N * L * E * E + 4 * N * H * L * L * D),
        transcendentals=int(N * H * L * L),
        bytes_accessed=int(
            jnp.dtype(compute_dtype).itemsize * (3 * N * L * E + (N // B) * 4 * E * E)
            + 4 * (L * L + N * H * L * L + N * L * E)),
    )

    attention, out = pl.pallas_call(
        _self_attention_kernel,
        out_shape=out_shapes,
        grid_spec=grid_spec,
        compiler_params=pltpu.CompilerParams(
            dimension_semantics=("parallel", "arbitrary"),
            vmem_limit_bytes=vmem_budget,
        ),
        cost_estimate=cost,
    )(v_c, k_c, q_c, mask_bias, wvh, bvh, wkh, bkh, wqh, bqh, woh, bo_f)

    return attention, out


# ---------------------------------------------------------------------------
# Pure-JAX reference mirroring the PyTorch forward exactly (f32).
# ---------------------------------------------------------------------------
def self_attention_reference(values, keys, query, mask, params, heads):
    wv, bv, wk, bk, wq, bq, wo, bo = params
    N, L, E = query.shape
    H = heads
    D = E // H
    v = values @ wv.T + bv[0]
    k = keys @ wk.T + bk[0]
    q = query @ wq.T + bq[0]
    v = v.reshape(N, L, H, D)
    k = k.reshape(N, L, H, D)
    q = q.reshape(N, L, H, D)
    energy = jnp.einsum("nqhd,nkhd->nhqk", q, k)
    if mask is not None:
        energy = jnp.where(mask[None, None, :, :] == 0, jnp.float32(-1e20), energy)
    attn = jax.nn.softmax(energy / jnp.sqrt(jnp.float32(E)), axis=3)
    out = jnp.einsum("nhql,nlhd->nqhd", attn, v).reshape(N, L, E)
    out = out @ wo.T + bo[0]
    return attn, out


if __name__ == "__main__":
    # Small shapes consistent with the module's forward:
    # batch N=2, seq_len L=8, embed_size E=32, heads H=4 (head_dim=8).
    N, L, E, H = 2, 8, 32, 4

    key = jax.random.PRNGKey(0)
    ks = jax.random.split(key, 12)

    bound = 1.0 / math.sqrt(E)                 # torch.nn.Linear default init
    def u(k, shape):
        return jax.random.uniform(k, shape, jnp.float32, -bound, bound)

    wv, bv = u(ks[0], (E, E)), u(ks[1], (1, E))
    wk, bk = u(ks[2], (E, E)), u(ks[3], (1, E))
    wq, bq = u(ks[4], (E, E)), u(ks[5], (1, E))
    wo, bo = u(ks[6], (E, E)), u(ks[7], (1, E))
    params = (wv, bv, wk, bk, wq, bq, wo, bo)

    values = jax.random.normal(ks[8], (N, L, E), jnp.float32)
    keys_ = jax.random.normal(ks[9], (N, L, E), jnp.float32)
    query = jax.random.normal(ks[10], (N, L, E), jnp.float32)

    # TODO(synk): the original mask comes from a spaCy dependency parse
    # (from_parser2masking_temp); no in-kernel equivalent, so build a
    # synthetic dependency-style 0/1 mask (identity + random "child" edges).
    rand_edges = (jax.random.uniform(ks[11], (L, L)) > 0.6).astype(jnp.int32)
    mask = jnp.maximum(rand_edges, jnp.eye(L, dtype=jnp.int32))

    attn_k, out_k = self_attention_pallas(values, keys_, query, mask, params, H)
    jax.block_until_ready((attn_k, out_k))

    attn_r, out_r = self_attention_reference(values, keys_, query, mask, params, H)

    assert attn_k.shape == (N, H, L, L) and out_k.shape == (N, L, E)
    # Tolerances account for bf16 MXU inputs (f32 accumulation everywhere);
    # mask/softmax math is f32 and masked entries are exactly 0 in both paths.
    assert jnp.allclose(attn_k, attn_r, atol=2e-2, rtol=2e-2), "attention mismatch"
    assert jnp.allclose(out_k, out_r, atol=2e-2, rtol=2e-2), "output mismatch"

    print("KERNEL_OK")
</pallas_src>

<mosaic_0001>
module attributes {stable_mosaic.version = 11 : i64} {
  func.func @_self_attention_kernel(%arg0: i32, %arg1: i32, %arg2: memref<1x8x32xbf16, #tpu.memory_space<vmem>>, %arg3: memref<1x8x32xbf16, #tpu.memory_space<vmem>>, %arg4: memref<1x8x32xbf16, #tpu.memory_space<vmem>>, %arg5: memref<8x8xf32, #tpu.memory_space<vmem>>, %arg6: memref<1x32x8xbf16, #tpu.memory_space<vmem>>, %arg7: memref<1x1x8xf32, #tpu.memory_space<vmem>>, %arg8: memref<1x32x8xbf16, #tpu.memory_space<vmem>>, %arg9: memref<1x1x8xf32, #tpu.memory_space<vmem>>, %arg10: memref<1x32x8xbf16, #tpu.memory_space<vmem>>, %arg11: memref<1x1x8xf32, #tpu.memory_space<vmem>>, %arg12: memref<1x8x32xbf16, #tpu.memory_space<vmem>>, %arg13: memref<1x32xf32, #tpu.memory_space<vmem>>, %arg14: memref<1x1x8x8xf32, #tpu.memory_space<vmem>>, %arg15: memref<1x8x32xf32, #tpu.memory_space<vmem>>) attributes {dimension_semantics = [#tpu.dimension_semantics<parallel>, #tpu.dimension_semantics<arbitrary>], iteration_bounds = array<i64: 2, 4>, scalar_prefetch = 0 : i64, scratch_operands = 0 : i64, tpu.core_type = #tpu.core_type<tc>, window_params = [{transform_indices = @transform_0, window_bounds = array<i64: 1, 8, 32>}, {transform_indices = @transform_1, window_bounds = array<i64: 1, 8, 32>}, {transform_indices = @transform_2, window_bounds = array<i64: 1, 8, 32>}, {pipeline_mode = #tpu.pipeline_mode<synchronous>, transform_indices = @transform_3, window_bounds = array<i64: 8, 8>}, {transform_indices = @transform_4, window_bounds = array<i64: 1, 32, 8>}, {transform_indices = @transform_5, window_bounds = array<i64: 1, 1, 8>}, {transform_indices = @transform_6, window_bounds = array<i64: 1, 32, 8>}, {transform_indices = @transform_7, window_bounds = array<i64: 1, 1, 8>}, {transform_indices = @transform_8, window_bounds = array<i64: 1, 32, 8>}, {transform_indices = @transform_9, window_bounds = array<i64: 1, 1, 8>}, {transform_indices = @transform_10, window_bounds = array<i64: 1, 8, 32>}, {pipeline_mode = #tpu.pipeline_mode<synchronous>, transform_indices = @transform_11, window_bounds = array<i64: 1, 32>}, {transform_indices = @transform_12, window_bounds = array<i64: 1, 1, 8, 8>}, {transform_indices = @transform_13, window_bounds = array<i64: 1, 8, 32>}]} {
    %c0 = arith.constant 0 : index
    %c0_0 = arith.constant 0 : index
    %c0_1 = arith.constant 0 : index
    %0 = vector.load %arg2[%c0, %c0_0, %c0_1] : memref<1x8x32xbf16, #tpu.memory_space<vmem>>, vector<1x8x32xbf16>
    %1 = vector.shape_cast %0 : vector<1x8x32xbf16> to vector<8x32xbf16>
    %c0_2 = arith.constant 0 : index
    %c0_3 = arith.constant 0 : index
    %c0_4 = arith.constant 0 : index
    %2 = vector.load %arg3[%c0_2, %c0_3, %c0_4] : memref<1x8x32xbf16, #tpu.memory_space<vmem>>, vector<1x8x32xbf16>
    %3 = vector.shape_cast %2 : vector<1x8x32xbf16> to vector<8x32xbf16>
    %c0_5 = arith.constant 0 : index
    %c0_6 = arith.constant 0 : index
    %c0_7 = arith.constant 0 : index
    %4 = vector.load %arg4[%c0_5, %c0_6, %c0_7] : memref<1x8x32xbf16, #tpu.memory_space<vmem>>, vector<1x8x32xbf16>
    %5 = vector.shape_cast %4 : vector<1x8x32xbf16> to vector<8x32xbf16>
    %c0_8 = arith.constant 0 : index
    %c0_9 = arith.constant 0 : index
    %c0_10 = arith.constant 0 : index
    %6 = vector.load %arg6[%c0_8, %c0_9, %c0_10] : memref<1x32x8xbf16, #tpu.memory_space<vmem>>, vector<1x32x8xbf16>
    %7 = vector.shape_cast %6 : vector<1x32x8xbf16> to vector<32x8xbf16>
    %cst = arith.constant dense<0.000000e+00> : vector<8x8xf32>
    %8 = tpu.matmul %1, %7, %cst {dimension_numbers = #tpu.dot_dimension_numbers<[1], [0], [0], [1], [0, 0, 1, 1], [], []>} : vector<8x32xbf16>, vector<32x8xbf16>, vector<8x8xf32> -> vector<8x8xf32>
    %c0_11 = arith.constant 0 : index
    %c0_12 = arith.constant 0 : index
    %c0_13 = arith.constant 0 : index
    %9 = vector.load %arg7[%c0_11, %c0_12, %c0_13] : memref<1x1x8xf32, #tpu.memory_space<vmem>>, vector<1x1x8xf32>
    %10 = vector.shape_cast %9 : vector<1x1x8xf32> to vector<1x8xf32>
    %11 = vector.broadcast %10 : vector<1x8xf32> to vector<8x8xf32>
    %12 = arith.addf %8, %11 : vector<8x8xf32>
    %c0_14 = arith.constant 0 : index
    %c0_15 = arith.constant 0 : index
    %c0_16 = arith.constant 0 : index
    %13 = vector.load %arg8[%c0_14, %c0_15, %c0_16] : memref<1x32x8xbf16, #tpu.memory_space<vmem>>, vector<1x32x8xbf16>
    %14 = vector.shape_cast %13 : vector<1x32x8xbf16> to vector<32x8xbf16>
    %cst_17 = arith.constant dense<0.000000e+00> : vector<8x8xf32>
    %15 = tpu.matmul %3, %14, %cst_17 {dimension_numbers = #tpu.dot_dimension_numbers<[1], [0], [0], [1], [0, 0, 1, 1], [], []>} : vector<8x32xbf16>, vector<32x8xbf16>, vector<8x8xf32> -> vector<8x8xf32>
    %c0_18 = arith.constant 0 : index
    %c0_19 = arith.constant 0 : index
    %c0_20 = arith.constant 0 : index
    %16 = vector.load %arg9[%c0_18, %c0_19, %c0_20] : memref<1x1x8xf32, #tpu.memory_space<vmem>>, vector<1x1x8xf32>
    %17 = vector.shape_cast %16 : vector<1x1x8xf32> to vector<1x8xf32>
    %18 = vector.broadcast %17 : vector<1x8xf32> to vector<8x8xf32>
    %19 = arith.addf %15, %18 : vector<8x8xf32>
    %c0_21 = arith.constant 0 : index
    %c0_22 = arith.constant 0 : index
    %c0_23 = arith.constant 0 : index
    %20 = vector.load %arg10[%c0_21, %c0_22, %c0_23] : memref<1x32x8xbf16, #tpu.memory_space<vmem>>, vector<1x32x8xbf16>
    %21 = vector.shape_cast %20 : vector<1x32x8xbf16> to vector<32x8xbf16>
    %cst_24 = arith.constant dense<0.000000e+00> : vector<8x8xf32>
    %22 = tpu.matmul %5, %21, %cst_24 {dimension_numbers = #tpu.dot_dimension_numbers<[1], [0], [0], [1], [0, 0, 1, 1], [], []>} : vector<8x32xbf16>, vector<32x8xbf16>, vector<8x8xf32> -> vector<8x8xf32>
    %c0_25 = arith.constant 0 : index
    %c0_26 = arith.constant 0 : index
    %c0_27 = arith.constant 0 : index
    %23 = vector.load %arg11[%c0_25, %c0_26, %c0_27] : memref<1x1x8xf32, #tpu.memory_space<vmem>>, vector<1x1x8xf32>
    %24 = vector.shape_cast %23 : vector<1x1x8xf32> to vector<1x8xf32>
    %25 = vector.broadcast %24 : vector<1x8xf32> to vector<8x8xf32>
    %26 = arith.addf %22, %25 : vector<8x8xf32>
    %cst_28 = arith.constant 0.176776692 : f32
    %27 = vector.broadcast %cst_28 : f32 to vector<8x8xf32>
    %28 = arith.mulf %26, %27 : vector<8x8xf32>
    %29 = vector.shape_cast %28 : vector<8x8xf32> to vector<1x8x8xf32>
    %30 = arith.truncf %29 : vector<1x8x8xf32> to vector<1x8x8xbf16>
    %31 = vector.shape_cast %19 : vector<8x8xf32> to vector<1x8x8xf32>
    %32 = arith.truncf %31 : vector<1x8x8xf32> to vector<1x8x8xbf16>
    %33 = vector.shape_cast %12 : vector<8x8xf32> to vector<1x8x8xf32>
    %34 = arith.truncf %33 : vector<1x8x8xf32> to vector<1x8x8xbf16>
    "tpu.trace_start"() <{level = 10 : i32, message = "bqd,bkd->bqk"}> : () -> ()
    %cst_29 = arith.constant dense<0.000000e+00> : vector<1x8x8xf32>
    %35 = tpu.matmul %30, %32, %cst_29 {dimension_numbers = #tpu.dot_dimension_numbers<[2], [2], [1], [1], [0, 0, 0, 1, 1, 1], [0], [0]>} : vector<1x8x8xbf16>, vector<1x8x8xbf16>, vector<1x8x8xf32> -> vector<1x8x8xf32>
    "tpu.trace_stop"() : () -> ()
    %c0_30 = arith.constant 0 : index
    %c0_31 = arith.constant 0 : index
    %36 = vector.load %arg5[%c0_30, %c0_31] : memref<8x8xf32, #tpu.memory_space<vmem>>, vector<8x8xf32>
    %37 = vector.shape_cast %36 : vector<8x8xf32> to vector<1x8x8xf32>
    %38 = arith.addf %35, %37 : vector<1x8x8xf32>
    %cst_32 = arith.constant dense<0xFF800000> : vector<1x8xf32>
    %39 = vector.multi_reduction <maximumf>, %38, %cst_32 [2] : vector<1x8x8xf32> to vector<1x8xf32>
    %40 = vector.shape_cast %39 : vector<1x8xf32> to vector<1x8x1xf32>
    %41 = vector.broadcast %40 : vector<1x8x1xf32> to vector<1x8x8xf32>
    %42 = arith.subf %38, %41 : vector<1x8x8xf32>
    %43 = math.exp %42 : vector<1x8x8xf32>
    %cst_33 = arith.constant dense<0.000000e+00> : vector<1x8xf32>
    %44 = vector.multi_reduction <add>, %43, %cst_33 [2] : vector<1x8x8xf32> to vector<1x8xf32>
    %45 = vector.shape_cast %44 : vector<1x8xf32> to vector<1x8x1xf32>
    %46 = tpu.reciprocal %45 : vector<1x8x1xf32> -> vector<1x8x1xf32>
    %47 = vector.broadcast %46 : vector<1x8x1xf32> to vector<1x8x8xf32>
    %48 = arith.mulf %43, %47 : vector<1x8x8xf32>
    %49 = vector.shape_cast %48 : vector<1x8x8xf32> to vector<1x1x8x8xf32>
    %c0_34 = arith.constant 0 : index
    %c0_35 = arith.constant 0 : index
    %c0_36 = arith.constant 0 : index
    %c0_37 = arith.constant 0 : index
    %50 = vector.load %arg14[%c0_34, %c0_35, %c0_36, %c0_37] : memref<1x1x8x8xf32, #tpu.memory_space<vmem>>, vector<1x1x8x8xf32>
    tpu.vector_store %arg14[%c0_34, %c0_35, %c0_36, %c0_37], %49 {strides = array<i32>} : memref<1x1x8x8xf32, #tpu.memory_space<vmem>>, vector<1x1x8x8xf32>,
    %51 = arith.truncf %48 : vector<1x8x8xf32> to vector<1x8x8xbf16>
    "tpu.trace_start"() <{level = 10 : i32, message = "bqk,bkd->bqd"}> : () -> ()
    %cst_38 = arith.constant dense<0.000000e+00> : vector<1x8x8xf32>
    %52 = tpu.matmul %51, %34, %cst_38 {dimension_numbers = #tpu.dot_dimension_numbers<[2], [1], [1], [2], [0, 0, 0, 1, 1, 2], [0], [0]>} : vector<1x8x8xbf16>, vector<1x8x8xbf16>, vector<1x8x8xf32> -> vector<1x8x8xf32>
    "tpu.trace_stop"() : () -> ()
    %53 = vector.shape_cast %52 : vector<1x8x8xf32> to vector<8x8xf32>
    %54 = arith.truncf %53 : vector<8x8xf32> to vector<8x8xbf16>
    %c0_39 = arith.constant 0 : index
    %c0_40 = arith.constant 0 : index
    %c0_41 = arith.constant 0 : index
    %55 = vector.load %arg12[%c0_39, %c0_40, %c0_41] : memref<1x8x32xbf16, #tpu.memory_space<vmem>>, vector<1x8x32xbf16>
    %56 = vector.shape_cast %55 : vector<1x8x32xbf16> to vector<8x32xbf16>
    %cst_42 = arith.constant dense<0.000000e+00> : vector<8x32xf32>
    %57 = tpu.matmul %54, %56, %cst_42 {dimension_numbers = #tpu.dot_dimension_numbers<[1], [0], [0], [1], [0, 0, 1, 1], [], []>} : vector<8x8xbf16>, vector<8x32xbf16>, vector<8x32xf32> -> vector<8x32xf32>
    %58 = vector.shape_cast %57 : vector<8x32xf32> to vector<1x8x32xf32>
    %c0_i32 = arith.constant 0 : i32
    %59 = arith.cmpi eq, %arg1, %c0_i32 : i32
    %60 = arith.extui %59 : i1 to i32
    %c0_i32_43 = arith.constant 0 : i32
    %61 = arith.cmpi ne, %60, %c0_i32_43 : i32
    scf.if %61 {
      %c0_50 = arith.constant 0 : index
      %c0_51 = arith.constant 0 : index
      %65 = vector.load %arg13[%c0_50, %c0_51] : memref<1x32xf32, #tpu.memory_space<vmem>>, vector<1x32xf32>
      %66 = vector.shape_cast %65 : vector<1x32xf32> to vector<1x1x32xf32>
      %67 = vector.broadcast %66 : vector<1x1x32xf32> to vector<1x8x32xf32>
      %c0_52 = arith.constant 0 : index
      %c0_53 = arith.constant 0 : index
      %c0_54 = arith.constant 0 : index
      %68 = vector.load %arg15[%c0_52, %c0_53, %c0_54] : memref<1x8x32xf32, #tpu.memory_space<vmem>>, vector<1x8x32xf32>
      tpu.vector_store %arg15[%c0_52, %c0_53, %c0_54], %67 {strides = array<i32>} : memref<1x8x32xf32, #tpu.memory_space<vmem>>, vector<1x8x32xf32>,
    } else {
    }
    %c0_44 = arith.constant 0 : index
    %c0_45 = arith.constant 0 : index
    %c0_46 = arith.constant 0 : index
    %62 = vector.load %arg15[%c0_44, %c0_45, %c0_46] : memref<1x8x32xf32, #tpu.memory_space<vmem>>, vector<1x8x32xf32>
    %63 = arith.addf %62, %58 : vector<1x8x32xf32>
    %c0_47 = arith.constant 0 : index
    %c0_48 = arith.constant 0 : index
    %c0_49 = arith.constant 0 : index
    %64 = vector.load %arg15[%c0_47, %c0_48, %c0_49] : memref<1x8x32xf32, #tpu.memory_space<vmem>>, vector<1x8x32xf32>
    tpu.vector_store %arg15[%c0_47, %c0_48, %c0_49], %63 {strides = array<i32>} : memref<1x8x32xf32, #tpu.memory_space<vmem>>, vector<1x8x32xf32>,
    return
  }
  func.func @transform_0(%arg0: i32, %arg1: i32) -> (i32, i32, i32) {
    %c0_i32 = arith.constant 0 : i32
    %c0_i32_0 = arith.constant 0 : i32
    %c0_i32_1 = arith.constant 0 : i32
    return %arg0, %c0_i32, %c0_i32_0 : i32, i32, i32
  }
  func.func @transform_1(%arg0: i32, %arg1: i32) -> (i32, i32, i32) {
    %c0_i32 = arith.constant 0 : i32
    %c0_i32_0 = arith.constant 0 : i32
    %c0_i32_1 = arith.constant 0 : i32
    return %arg0, %c0_i32, %c0_i32_0 : i32, i32, i32
  }
  func.func @transform_2(%arg0: i32, %arg1: i32) -> (i32, i32, i32) {
    %c0_i32 = arith.constant 0 : i32
    %c0_i32_0 = arith.constant 0 : i32
    %c0_i32_1 = arith.constant 0 : i32
    return %arg0, %c0_i32, %c0_i32_0 : i32, i32, i32
  }
  func.func @transform_3(%arg0: i32, %arg1: i32) -> (i32, i32) {
    %c0_i32 = arith.constant 0 : i32
    %c0_i32_0 = arith.constant 0 : i32
    %c0_i32_1 = arith.constant 0 : i32
    return %c0_i32, %c0_i32_0 : i32, i32
  }
  func.func @transform_4(%arg0: i32, %arg1: i32) -> (i32, i32, i32) {
    %c0_i32 = arith.constant 0 : i32
    %c0_i32_0 = arith.constant 0 : i32
    %c0_i32_1 = arith.constant 0 : i32
    return %arg1, %c0_i32, %c0_i32_0 : i32, i32, i32
  }
  func.func @transform_5(%arg0: i32, %arg1: i32) -> (i32, i32, i32) {
    %c0_i32 = arith.constant 0 : i32
    %c0_i32_0 = arith.constant 0 : i32
    %c0_i32_1 = arith.constant 0 : i32
    return %arg1, %c0_i32, %c0_i32_0 : i32, i32, i32
  }
  func.func @transform_6(%arg0: i32, %arg1: i32) -> (i32, i32, i32) {
    %c0_i32 = arith.constant 0 : i32
    %c0_i32_0 = arith.constant 0 : i32
    %c0_i32_1 = arith.constant 0 : i32
    return %arg1, %c0_i32, %c0_i32_0 : i32, i32, i32
  }
  func.func @transform_7(%arg0: i32, %arg1: i32) -> (i32, i32, i32) {
    %c0_i32 = arith.constant 0 : i32
    %c0_i32_0 = arith.constant 0 : i32
    %c0_i32_1 = arith.constant 0 : i32
    return %arg1, %c0_i32, %c0_i32_0 : i32, i32, i32
  }
  func.func @transform_8(%arg0: i32, %arg1: i32) -> (i32, i32, i32) {
    %c0_i32 = arith.constant 0 : i32
    %c0_i32_0 = arith.constant 0 : i32
    %c0_i32_1 = arith.constant 0 : i32
    return %arg1, %c0_i32, %c0_i32_0 : i32, i32, i32
  }
  func.func @transform_9(%arg0: i32, %arg1: i32) -> (i32, i32, i32) {
    %c0_i32 = arith.constant 0 : i32
    %c0_i32_0 = arith.constant 0 : i32
    %c0_i32_1 = arith.constant 0 : i32
    return %arg1, %c0_i32, %c0_i32_0 : i32, i32, i32
  }
  func.func @transform_10(%arg0: i32, %arg1: i32) -> (i32, i32, i32) {
    %c0_i32 = arith.constant 0 : i32
    %c0_i32_0 = arith.constant 0 : i32
    %c0_i32_1 = arith.constant 0 : i32
    return %arg1, %c0_i32, %c0_i32_0 : i32, i32, i32
  }
  func.func @transform_11(%arg0: i32, %arg1: i32) -> (i32, i32) {
    %c0_i32 = arith.constant 0 : i32
    %c0_i32_0 = arith.constant 0 : i32
    %c0_i32_1 = arith.constant 0 : i32
    return %c0_i32, %c0_i32_0 : i32, i32
  }
  func.func @transform_12(%arg0: i32, %arg1: i32) -> (i32, i32, i32, i32) {
    %c0_i32 = arith.constant 0 : i32
    %c0_i32_0 = arith.constant 0 : i32
    %c0_i32_1 = arith.constant 0 : i32
    return %arg0, %arg1, %c0_i32, %c0_i32_0 : i32, i32, i32, i32
  }
  func.func @transform_13(%arg0: i32, %arg1: i32) -> (i32, i32, i32) {
    %c0_i32 = arith.constant 0 : i32
    %c0_i32_0 = arith.constant 0 : i32
    %c0_i32_1 = arith.constant 0 : i32
    return %arg0, %c0_i32, %c0_i32_0 : i32, i32, i32
  }
}

</mosaic_0001>

<bundles_post_ra>
// kernel: tpu_custom_call.1
= control target key start
LH: loop header
LB: loop body
LE: loop exit
PB: predicated region body
PF: predicated region fallthrough
CT: control target
= control target key end

     0   :  { %s1742_s0 = inlined_call_operand.vmem [shape: bf16[2,8,32], index: 0, kind: input, shape index: {}]   ;;  %s1743_s1 = inlined_call_operand.vmem [shape: bf16[2,8,32], index: 1, kind: input, shape index: {}]   ;;  %s1744_s2 = inlined_call_operand.vmem [shape: bf16[2,8,32], index: 2, kind: input, shape index: {}]   ;;  %s1745_s3 = inlined_call_operand.vmem [shape: f32[8,8], index: 3, kind: input, shape index: {}]   ;;  %s1746_s4 = inlined_call_operand.vmem [shape: bf16[4,32,8], index: 4, kind: input, shape index: {}]   ;;  %s1747_s5 = inlined_call_operand.vmem [shape: f32[4,1,8], index: 5, kind: input, shape index: {}]   ;;  %s1748_s6 = inlined_call_operand.vmem [shape: bf16[4,32,8], index: 6, kind: input, shape index: {}]   ;;  %s1749_s7 = inlined_call_operand.vmem [shape: f32[4,1,8], index: 7, kind: input, shape index: {}]   ;;  %s1750_s8 = inlined_call_operand.vmem [shape: bf16[4,32,8], index: 8, kind: input, shape index: {}]   ;;  %s1751_s9 = inlined_call_operand.vmem [shape: f32[4,1,8], index: 9, kind: input, shape index: {}]   ;;  %s1752_s10 = inlined_call_operand.vmem [shape: bf16[4,8,32], index: 10, kind: input, shape index: {}]   ;;  %s1753_s11 = inlined_call_operand.vmem [shape: f32[1,32], index: 11, kind: input, shape index: {}]   ;;  %s1754_s12 = inlined_call_operand.hbm [shape: f32[2,4,8,8], index: 12, kind: output, shape index: {0}]   ;;  %s1755_s13 = inlined_call_operand.hbm [shape: f32[2,8,32], index: 13, kind: output, shape index: {1}]  }
   0x1   :  { %1771 = sst [smem:[#allocation19_spill]] %s1742_s0 }
   0x2   :  { %1772 = sst [smem:[#allocation20_spill]] %s1743_s1 }
   0x3   :  { %1773 = sst [smem:[#allocation21_spill]] %s1744_s2 }
   0x4   :  { %1774 = sst [smem:[#allocation22_spill]] %s1745_s3 }
   0x5   :  { %1775 = sst [smem:[#allocation23_spill]] %s1746_s4 }
   0x6   :  { %1776 = sst [smem:[#allocation24_spill]] %s1747_s5 }
   0x7   :  { %1777 = sst [smem:[#allocation25_spill]] %s1748_s6 }
   0x8   :  { %1778 = sst [smem:[#allocation26_spill]] %s1749_s7 }
   0x9   :  { %1779 = sst [smem:[#allocation27_spill]] %s1752_s10 }
   0xa   :  { %1780 = sst [smem:[#allocation28_spill]] %s1753_s11 }
   0xb   :  { %1781 = sst [smem:[#allocation29_spill]] %s1754_s12 }
   0xc   :  { %1782 = sst [smem:[#allocation30_spill]] %s1755_s13 }
   0xd   :  { %19 = vsyncpa [#allocation3], 0 }
   0xe   :  { %21 = vsyncpa [#allocation3 + $0x1], 0 }
   0xf   :  { %22 = vsyncpa [#allocation5], 0 }
  0x10   :  { %24 = vsyncpa [#allocation5 + $0x1], 0  ;;  %s1466_s25 = smov 0   ;;  %s1468_s26 = smov 0  }
  0x11   :  { %s1470_s27 = smov 0   ;;  %s1472_s28 = smov 0  }
  0x12   :  { %s1474_s29 = smov 0   ;;  %s1476_s30 = smov 0  }
  0x13   :  { %s1478_s14 = smov 0   ;;  %s1480_s15 = smov 0  }
  0x14   :  { %s1482_s16 = smov 0   ;;  %s1484_s17 = smov 0  }
  0x15   :  { %s1486_s18 = smov 0  }
  0x16 LB: > { %1783 = sst [smem:[#allocation8_spill]] %s1362_s27  ;;  %s1072_s19 = sadd.s32 4294967295, %s1394_s18   ;;  %s1394_s18 = sphi %s1486_s18, %s30_s18   ;;  %s1390_s17 = sphi %s1484_s17, %s1826_s17   ;;  %s1386_s16 = sphi %s1482_s16, %s1825_s16   ;;  %s1382_s15 = sphi %s1480_s15, %s1824_s15   ;;  %s1378_s14 = sphi %s1478_s14, %s1823_s14   ;;  %s1374_s30 = sphi %s1476_s30, %s1822_s30   ;;  %s1370_s29 = sphi %s1474_s29, %s1821_s29   ;;  %s1366_s28 = sphi %s1472_s28, %s1820_s28   ;;  %s1362_s27 = sphi %s1470_s27, %s1819_s27   ;;  %s1358_s26 = sphi %s1468_s26, %s1828_s26   ;;  %s1354_s25 = sphi %s1466_s25, %s1827_s25  }
  0x17   : > { %1784 = sst [smem:[#allocation9_spill]] %s1366_s28  ;;  %s1073_s20 = sadd.s32 4294967294, %s1394_s18  }
  0x18   : > { %1785 = sst [smem:[#allocation10_spill]] %s1370_s29  ;;  %s39_s21 = sadd.s32 1, %s1386_s16 }
  0x19   : > { %1786 = sst [smem:[#allocation11_spill]] %s1374_s30  ;;  %s42_s22 = sadd.s32 1, %s1390_s17 }
  0x1a   : > { %1787 = sst [smem:[#allocation12_spill]] %s1386_s16  ;;  %p40_p0 = scmp.ge.s32.totalorder %s39_s21, 4 }
  0x1b   : > { %1788 = sst [smem:[#allocation13_spill]] %s1390_s17  ;;  %s353_s23 = sadd.s32 1, %s1374_s30 }
  0x1c   : > { %p363_p1 = scmp.ne.s32.totalorder %s1374_s30, %s1370_s29  ;;  %p1528_p2 = scmp.eq.s32.totalorder %s1072_s19, 7 }
  0x1d   : > { %s1830_s21 = smov (%p40_p0, %s39_s21), 0  ;;  %s1832_s22 = smov (!%p40_p0, %s42_s22), %s1390_s17 }
  0x1e   : > { %1790 = sst [smem:[#allocation14_spill]] %s1830_s21  ;;  %s349_s13 = ssub.s32 %s1386_s16, %s1830_s21 }
  0x1f   : > { %p1539_p3 = por %p1528_p2, %p363_p1  ;;  %p44_p4 = scmp.ge.s32.totalorder %s1832_s22, 2 }
  0x20   : > { %p369_p5 = scmp.ne.s32.totalorder %s1370_s29, %s1366_s28  ;;  %p1545_p6 = scmp.eq.s32.totalorder %s1073_s20, 7 }
  0x21   : > { %s1791_s12 = scalar_select %p1539_p3, 1, 0 }
  0x22   : > { %s379_s11 = sadd.s32 1, %s1362_s27  ;;  %s1834_s22 = smov (%p44_p4, %s1832_s22), 0 }
  0x23   : > { %1792 = sst [smem:[#allocation15_spill]] %s1791_s12  ;;  %p1554_p7 = por %p1545_p6, %p369_p5 }
  0x24   : > { %1794 = sst [smem:[#allocation16_spill]] %s1834_s22  ;;  %p389_p8 = scmp.ne.s32.totalorder %s1362_s27, %s1358_s26 }
  0x25   : > { %s348_s16 = ssub.s32 %s1390_s17, %s1834_s22  ;;  %p395_p9 = scmp.ne.s32.totalorder %s1358_s26, %s1354_s25 }
  0x26   : > { %s350_s28 = sor.u32 %s349_s13, %s348_s16  ;;  %p377_p10 = scmp.eq.s32.totalorder %s348_s16, 0 }
  0x27   : > { %p351_p11 = scmp.eq.s32.totalorder %s350_s28, 0  ;;  %p1566_p12 = por %p389_p8, %p1528_p2 }
  0x28   : > { %s1571_s12 = scalar_select %p377_p10, %s1362_s27, %s379_s11  }
  0x29   : > { %s1574_s10 = scalar_select %p351_p11, %s1374_s30, %s353_s23  }
  0x2a   : > { %1797 = sst [smem:[#allocation17_spill]] %s1571_s12  ;;  %p1578_p13 = por %p395_p9, %p1545_p6 }
  0x2b   : > { %1798 = sst [smem:[#allocation18_spill]] %s1574_s10  ;;  %p1076_p0 = scmp.ge.s32.totalorder %s1394_s18, 1 }
  0x2c   : > { %p490_p1 = scmp.lt.s32.totalorder %s1394_s18, 9 }
  0x2e   : > { %p491_p4 = pnand %p1076_p0, %p490_p1 }
  0x2f   : > { %p586_p2 = scmp.lt.s32.totalorder (!%p491_p4), %s1378_s14, 3  ;;  %p574_p5 = scmp.lt.s32.totalorder (!%p491_p4), %s1382_s15, 1 }
  0x30   : > { %494 = sbr.rel (%p491_p4) target bundleno = 903 (0x387), region = 68  ;;  %s1800_s7 = sld [smem:[#allocation26_spill]] (!%p491_p4) }
  0x31   : > { %s1801_s6 = sld [smem:[#allocation25_spill]] (!%p491_p4)  ;;  %p1119_p6 = scmp.ne.s32.totalorder (!%p491_p4), %s1378_s14, 0 }
  0x32   : > { %s1802_s1 = sld [smem:[#allocation20_spill]] (!%p491_p4) }
  0x33   : > { %s1803_s2 = sld [smem:[#allocation21_spill]] (!%p491_p4) }
  0x34   : > { %s1804_s4 = sld [smem:[#allocation23_spill]] (!%p491_p4) }
  0x35   : > { %s1587_s13 = scalar_select %p586_p2, %s1378_s14, 3  ;;  %vm638_vm0 = vcmask 261120   ;;  %vm732_vm1 = vcmask 64512   ;;  %vm781_vm2 = vcmask 1043456  }
  0x36   : > { %s575_s11 = scalar_select %p574_p5, %s1382_s15, 1 }
  0x37   : > { %s1591_s28 = sshll.u32 %s1587_s13, 4  ;;  %s601_s24 = scalar_lea.vmem %s1800_s7, %s1587_s13 }
  0x38   : > { %s598_s17 = scalar_lea.vmem %s1801_s6, %s1591_s28  ;;  %s606_s12 = scalar_lea.vmem %s1750_s8, %s1591_s28  ;;  %v1236_v6 = vld [vmem:[%s601_s24] ss:$0 sm:$0xff] }
  0x39   : > { %v1133_v0 = vld [vmem:[%s598_s17 + $0x8] sm:$0xff]  ;;  %s1605_s27 = sshll.u32 %s575_s11, 2  ;;  %v1132_v2 = vld [vmem:[%s598_s17] sm:$0xff]  ;;  %s1769_s6 = sand.u32 1, %s1358_s26  }
  0x3a   : > { %v1135_v1 = vld [vmem:[%s606_s12 + $0x8] sm:$0xff]  ;;  %684 = vmatpush.bf16.msra.mxu1 %v1133_v0  ;;  %v1134_v3 = vld [vmem:[%s606_s12] sm:$0xff]  ;;  %s581_s22 = scalar_lea.vmem %s1802_s1, %s1605_s27  ;;  %s585_s10 = scalar_lea.vmem %s1803_s2, %s1605_s27 }
  0x3b   : > { %720 = vmatpush.bf16.msra.mxu2 %v1135_v1  ;;  %v616_v4 = vld [vmem:[%s581_s22] sm:$0xf]  ;;  %s609_s12 = scalar_lea.vmem %s1751_s9, %s1587_s13  ;;  %s1626_s11 = sshll.u32 %s1769_s6, 3 }
  0x3c   : > { %v617_v5 = vld [vmem:[%s585_s10] sm:$0xf]  ;;  %s590_s23 = scalar_lea.vmem %s1804_s4, %s1591_s28  ;;  %s1805_s0 = sld [smem:[#allocation19_spill]] }
  0x3d   : > { %v1237_v10 = vld [vmem:[%s609_s12] ss:$0 sm:$0xff]  ;;  %v1131_v18 = vld [vmem:[%s590_s23 + $0x8] sm:$0xff]  ;;  %s1806_s3 = sld [smem:[#allocation22_spill]]  ;;  %s1088_s16 = sshll.u32 %s1587_s13, 2 }
  0x3e   : > { %685 = vmatpush.bf16.msra.mxu1 %v1132_v2  ;;  %648 = vmatpush.bf16.msra.mxu0 %v1131_v18  ;;  %v1130_v19 = vld [vmem:[%s590_s23] sm:$0xff]  ;;  %s1807_s5 = sld [smem:[#allocation24_spill]]  ;;  %s1657_s28 = scalar_lea.vmem [#allocation4], %s1626_s11 }
  0x3f   : > { %721 = vmatpush.bf16.msra.mxu2 %v1134_v3  ;;  %s1809_s19 = sld [smem:[#allocation27_spill]] }
  0x41   : > { %1106 = vmatmul.msk.bf16.vlgmr.msra.gmra.mxu1 %vm638_vm0, %v616_v4 }
  0x42   : > { %1115 = vmatmul.msk.bf16.vlgmr.msra.gmra.mxu2 %vm638_vm0, %v617_v5  ;;  %s577_s10 = scalar_lea.vmem %s1805_s0, %s1605_s27  ;;  %649 = vmatpush.bf16.msra.mxu0 %v1130_v19  ;;  %s1808_s27 = sld [smem:[#allocation10_spill]] }
  0x43   : > { %v615_v20 = vld [vmem:[%s577_s10] sm:$0xf] }
  0x44   : > { %v731_v21 = vld [vmem:[%s1806_s3] sm:$0xff]  ;;  %s593_s24 = scalar_lea.vmem %s1807_s5, %s1587_s13 }
  0x45   : > { %1097 = vmatmul.msk.bf16.vlgmr.msra.gmra.mxu0 %vm638_vm0, %v615_v20  ;;  %v1238_v33 = vld [vmem:[%s593_s24] ss:$0 sm:$0xff]  ;;  %s613_s10 = scalar_lea.vmem %s1809_s19, %s1088_s16 }
  0x46   : > { %v799_v37 = vld [vmem:[%s613_s10] sm:$0xf] }
  0x47   : > { %v804_v38 = vsel %vm781_vm2, %v799_v37, 0 }
  0x48   : > { %813 = vmatpush.bf16.msrb.mxu1 %v804_v38  ;;  %s1770_s30 = sand.u32 1, %s1808_s27   ;;  %s1810_s27 = sld [smem:[#allocation28_spill]] (!%p1119_p6) }
  0x49   : > { %s1077_s13 = sshll.u32 %s1770_s30, 3 }
  0x4a   : > { %s566_s17 = scalar_lea.vmem [#allocation2], %s1077_s13 }
  0xbe   : > { %v687_v7 = vpop.f32.mrf.mxu1 }
  0xbf   : > { %v688_v8 = vadd.f32 %v1236_v6, %v687_v7 }
  0xc1   : > { %v729_v9 = vpack.c.bf16 %v688_v8, %v688_v8 }
  0xc2   : > { %v651_v26 = vpop.f32.mrf.mxu0 }
  0xc3   : > { %v737_v11 = vsel %vm732_vm1, %v729_v9, 0  ;;  %v652_v34 = vadd.f32 %v1238_v33, %v651_v26 }
  0xc4   : > { %746 = vmatpush.bf16.xpose.msra.mxu3 %v737_v11 }
  0xc5   : > { %v723_v12 = vpop.f32.mrf.mxu2  ;;  %v730_v35 = vpack.c.bf16 %v652_v34, %v652_v34 }
  0xc6   : > { %v724_v13 = vadd.f32 %v1237_v10, %v723_v12  ;;  %v689_v14 = vpop.f32.mrf.mxu1 }
  0xc7   : > { %v783_v36 = vsel %vm781_vm2, %v730_v35, 0 }
  0xc8   : > { %v727_v15 = vmul.f32 0.17677669, %v724_v13  ;;  %792 = vmatpush.bf16.msrb.mxu0 %v783_v36 }
  0xca   : > { %v728_v16 = vpack.c.bf16 %v727_v15, %v727_v15  ;;  %v653_v27 = vpop.f32.mrf.mxu0 }
  0xcc   : > { %1116 = vmatmul.msk.bf16.vlgmr.msra.gmra.mxu3 %vm732_vm1, %v728_v16 }
  0xcd   : > { %v725_v17 = vpop.f32.mrf.mxu2 }
 0x14f   : > { %v748_v22 = vpop.f32.mrf.mxu3 }
 0x150   : > { %v749_v23 = vadd.f32 %v748_v22, %v731_v21 }
 0x152   : > { %v752_v24 = vsel %vm732_vm1, %v749_v23, -inf }
 0x153   : > { %753 = vmax.xlane.f32.xlu0 %v752_v24 }
 0x157   : > { %v750_v25 = vpop.f32.mrf.mxu3 }
 0x1c6   : > { %v754_v28 = vpop.xlane.xlu0 %753 }
 0x1c7   : > { %v755_v29 = vsub.f32 %v749_v23, %v754_v28 }
 0x1c9   : > { %v756_v30 = vmul.f32 1.442695, %v755_v29 }
 0x1cb   : > { %1239 = vpow2.f32 %v756_v30 }
 0x1d1   : > { %v1240_v31 = vpop.eup %1239 }
 0x1d2   : > { %v758_v32 = vsel %vm732_vm1, %v1240_v31, 0.0 }
 0x1d3   : > { %759 = vadd.xlane.f32.xlu0 %v758_v32 }
 0x246   : > { %v760_v39 = vpop.xlane.xlu0 %759 }
 0x247   : > { %1241 = vrcp.f32 %v760_v39  ;;  %v772_v43 = vand.u32 2147483648, %v760_v39  ;;  %v770_v45 = vand.u32 2147483647, %v760_v39  ;;  %vm766_vm4 = vweird.f32 %v760_v39 }
 0x249   : > { %v773_v47 = vor.u32 1.1754944e-38, %v772_v43  ;;  %vm771_vm6 = vcmp.eq.f32.partialorder %v770_v45, 8.507059e+37 }
 0x24d   : > { %v1242_v40 = vpop.eup %1241 }
 0x24e   : > { %v762_v41 = vmul.f32 %v1242_v40, %v760_v39  ;;  %vm767_vm3 = vweird.f32 %v1242_v40 }
 0x24f   : > { %vm768_vm5 = vmor %vm766_vm4, %vm767_vm3 }
 0x250   : > { %v763_v42 = vsub.f32 1.0, %v762_v41 }
 0x252   : > { %v764_v44 = vmul.f32 %v1242_v40, %v763_v42 }
 0x254   : > { %v765_v46 = vadd.f32 %v1242_v40, %v764_v44 }
 0x256   : > { %v769_v48 = vsel %vm768_vm5, %v1242_v40, %v765_v46 }
 0x257   : > { %v774_v49 = vsel %vm771_vm6, %v773_v47, %v769_v48 }
 0x258   : > { %v775_v50 = vmul.f32 %v1240_v31, %v774_v49 }
 0x25a   : > { %776 = vst.msk [vmem:[%s566_s17] sm:$0xff] %vm732_vm1, %v775_v50  ;;  %v777_v51 = vpack.c.bf16 %v775_v50, %v775_v50 }
 0x25c   : > { %1117 = vmatmul.msk.bf16.vlgmr.msrb.gmra.mxu0 %vm732_vm1, %v777_v51 }
 0x2d9   : > { %v794_v52 = vpop.f32.mrf.mxu0 }
 0x2da   : > { %v798_v53 = vpack.c.bf16 %v794_v52, %v794_v52 }
 0x2dc   : > { %1118 = vmatmul.msk.bf16.vlgmr.msrb.gmra.mxu1 %vm732_vm1, %v798_v53 }
 0x2e1   : > { %v796_v54 = vpop.f32.mrf.mxu0 }
 0x359   : > { %v815_v55 = vpop.f32.mrf.mxu1 }
 0x35d   : > { %822 = sbr.rel (%p1119_p6) target bundleno = 868 (0x364), region = 72 }
 0x361   : > { %v817_v56 = vpop.f32.mrf.mxu1 }
 0x362   : > { %v1243_v57 = vld [vmem:[%s1810_s27] ss:$0 sm:$0xff] }
 0x363   : > { %827 = vst.msk [vmem:[%s1657_s28] sm:$0xff] %vm638_vm0, %v1243_v57 }
 0x364 PF: > { %s1811_s16 = sld [smem:[#allocation10_spill]]  ;;  %s1122_s11 = sshll.u32 %s1382_s15, 2 }
 0x365   : > { %s847_s22 = sadd.s32 %s1378_s14, %s1122_s11  ;;  %s851_s19 = sshll.u32 %s566_s17, 4  ;;  %s852_s19 = int_to_ptr.vmem [resolvable:$true] %s851_s19 }
 0x366   : > { %s1123_s10 = sshll.u32 %s847_s22, 3  ;;  %s1813_s24 = sld [smem:[#allocation29_spill]] }
 0x367   : > { %s1124_s30 = sshll.u32 %s1382_s15, 3  ;;  %s1814_s2 = sld [smem:[#allocation30_spill]] }
 0x36a   : > { %v828_v58 = vld [vmem:[%s1657_s28] sm:$0xff]  ;;  %s1815_s4 = sand.u32 1, %s1811_s16  }
 0x36b   : > { %v829_v59 = vadd.f32 %v828_v58, %v815_v55  ;;  %s832_s5 = scalar_lea.sflag [#allocation3], %s1815_s4 }
 0x36c   : > { %s849_s27 = scalar_lea.hbm %s1813_s24, %s1123_s10  ;;  %s1264_s22 = scalar_lea.hbm %s1813_s24, 64 }
 0x36d   : > { %830 = vst.msk [vmem:[%s1657_s28] sm:$0xff] %vm638_vm0, %v829_v59  ;;  %s853_s6 = sshll.u32 %s849_s27, 4  ;;  %s863_s3 = scalar_lea.hbm %s1814_s2, %s1124_s30  ;;  %s854_s6 = int_to_ptr.hbm [resolvable:$true] %s853_s6 }
 0x36e   : > { %s1258_s7 = sshra.s32 %s854_s6, 4  ;;  %s1259_s7 = int_to_ptr.hbm [resolvable:$true] %s1258_s7 }
 0x36f   : > { %s1260_s14 = scalar_lea.hbm %s1259_s7, 8  ;;  %p1265_p11 = scmp.lt.s32.totalorder %s1259_s7, %s1813_s24 }
 0x370   : > { %p1261_p8 = scmp.ne.s32.totalorder %s1259_s7, %s1260_s14  ;;  %p1266_p0 = scmp.lt.s32.totalorder %s1264_s22, %s1260_s14 }
 0x372   : > { %p1262_p9 = pnand %p1261_p8, %p1539_p3  ;;  %p1267_p1 = por %p1266_p0, %p1265_p11 }
 0x374   : > { %p1263_p10 = pneg %p1262_p9 }
 0x376   : > { %p1268_p4 = pnand %p1267_p1, %p1263_p10 }
 0x378   : > { %1271 = shalt.err (!%p1268_p4)
}
 0x379   : > { %1136 = dma.vmem_to_hbm [thread:$0]  (%p1539_p3), %s852_s19, 128, %s854_s6, %s832_s5  }
 0x37a   : > { %s865_s0 = sshll.u32 %s1657_s28, 4  ;;  %s867_s1 = sshll.u32 %s863_s3, 4  ;;  %s866_s0 = int_to_ptr.vmem [resolvable:$true] %s865_s0  ;;  %s868_s1 = int_to_ptr.hbm [resolvable:$true] %s867_s1 }
 0x37b   : > { %s1816_s4 = sand.u32 1, %s1358_s26   ;;  %s1286_s16 = sshra.s32 %s868_s1, 4  ;;  %s1287_s16 = int_to_ptr.hbm [resolvable:$true] %s1286_s16 }
 0x37c   : > { %s837_s30 = scalar_lea.sflag [#allocation5], %s1816_s4  ;;  %s1288_s13 = scalar_lea.hbm %s1287_s16, 8 }
 0x37d   : > { %p1289_p2 = scmp.ne.s32.totalorder %s1287_s16, %s1288_s13  ;;  %s1292_s23 = scalar_lea.hbm %s1814_s2, 16 }
 0x37e   : > { %p1293_p3 = scmp.lt.s32.totalorder %s1287_s16, %s1814_s2  ;;  %p1294_p8 = scmp.lt.s32.totalorder %s1292_s23, %s1288_s13 }
 0x37f   : > { %p1290_p5 = pnand %p1289_p2, %p1566_p12 }
 0x380   : > { %p1295_p9 = por %p1294_p8, %p1293_p3 }
 0x381   : > { %p1291_p6 = pneg %p1290_p5 }
 0x383   : > { %p1296_p10 = pnand %p1295_p9, %p1291_p6 }
 0x385   : > { %1299 = shalt.err (!%p1296_p10)
}
 0x386   : > { %1137 = dma.vmem_to_hbm [thread:$0]  (%p1566_p12), %s866_s0, 128, %s868_s1, %s837_s30  }
 0x387 PF: > { %s1817_s3 = sld [smem:[#allocation9_spill]]  ;;  %p1147_p11 = scmp.ge.s32.totalorder %s1394_s18, 2 }
 0x389   : > { %p1141_p0 = pnand %p1147_p11, %p1554_p7 }
 0x38b   : > { %p1142_p1 = pneg %p1141_p0 }
 0x38d   : > { %s879_s5 = sand.u32 1, %s1817_s3  }
 0x38e   : > { %s880_s6 = scalar_lea.sflag [#allocation3], %s879_s5 }
 0x38f   : > { %1345 = dma.done.wait (%p1142_p1), %s880_s6, 128  }
 0x390   : > { %1347 = vsyncadd (%p1142_p1), %s880_s6, 4294967168  ;;  %s889_s28 = sand.u32 1, %s1354_s25   ;;  %p1144_p4 = pnand %p1147_p11, %p1578_p13 }
 0x391   : > { %s890_s20 = scalar_lea.sflag [#allocation5], %s889_s28 }
 0x392   : > { %p1145_p2 = pneg %p1144_p4 }
 0x394   : > { %1349 = dma.done.wait (%p1145_p2), %s890_s20, 128  }
 0x395   : > { %1351 = vsyncadd (%p1145_p2), %s890_s20, 4294967168  ;;  %s30_s18 = sadd.s32 1, %s1394_s18   ;;  %s1818_s19 = sld [smem:[#allocation8_spill]] }
 0x396   : > { %p27_p12 = scmp.ge.s32.totalorder %s30_s18, 10   ;;  %s1819_s27 = sld [smem:[#allocation17_spill]] }
 0x397   : > { %s1820_s28 = sld [smem:[#allocation10_spill]]  ;;  %s1827_s25 = smov %s1358_s26 }
 0x398   : > { %s1821_s29 = sld [smem:[#allocation11_spill]] }
 0x399   : > { %s1822_s30 = sld [smem:[#allocation18_spill]]  ;;  %29 = sbr.rel (!%p27_p12) target bundleno = 22 (0x16), region = 151 }
 0x39a   : > { %s1823_s14 = sld [smem:[#allocation12_spill]] }
 0x39b   : > { %s1824_s15 = sld [smem:[#allocation13_spill]]  ;;  %s1828_s26 = smov %s1818_s19 }
 0x39c   : > { %s1825_s16 = sld [smem:[#allocation14_spill]] }
 0x39d   : > { %s1826_s17 = sld [smem:[#allocation16_spill]] }
 0x39e   :  { %896 = vsyncpa [#allocation3], 1 }
 0x39f   :  { %898 = vsyncpa [#allocation3 + $0x1], 1 }
 0x3a0   :  { %899 = vsyncpa [#allocation5], 1 }
 0x3a1   :  { %901 = vsyncpa [#allocation5 + $0x1], 1 }

</bundles_post_ra>
